<compile_context>
chip_gen: v7x
topology: tpu7x:2x2x1
jax: 0.10.0
libtpu: 0.0.40
codegen_flags: <defaults>
</compile_context>

<pallas_src>
import jax
import jax.numpy as jnp
from jax.experimental import pallas as pl
from jax.experimental.pallas import tpu as pltpu

LANE = 128          # TPU lane width (last-dim tiling unit)
SUBLANE = 8         # TPU sublane width (second-to-last-dim tiling unit)
HIDDEN = 64         # hidden size of the PyTorch module
H_PAD = LANE        # hidden / act dims padded to full lane width


def _round_up(x, m):
    return (x + m - 1) // m * m


# ---------------------------------------------------------------------------
# Kernel: whole 3-layer MLP on one (tile_m, OBS_P) batch tile.
# ---------------------------------------------------------------------------
def policy_mlp_kernel(x_ref, w_ref, b_ref, out_ref):
    obs_p = x_ref.shape[1]          # static: padded obs dim (multiple of 8)
    h_p = w_ref.shape[1]            # static: 128 (padded hidden / act width)

    x = x_ref[...]                                        # (tile_m, obs_p)

    # Static, sublane-aligned slices of the packed weight slab (no re-layout).
    w1 = w_ref[0:obs_p, :]                                # (obs_p, 128)
    w2 = w_ref[obs_p:obs_p + h_p, :]                      # (128, 128)
    w3 = w_ref[obs_p + h_p:obs_p + 2 * h_p, :]            # (128, 128)
    b1 = b_ref[0:1, :]
    b2 = b_ref[1:2, :]
    b3 = b_ref[2:3, :]

    h1 = jnp.maximum(jnp.dot(x, w1, preferred_element_type=jnp.float32) + b1, 0.0)
    h2 = jnp.maximum(jnp.dot(h1, w2, preferred_element_type=jnp.float32) + b2, 0.0)
    out_ref[...] = jnp.dot(h2, w3, preferred_element_type=jnp.float32) + b3


# ---------------------------------------------------------------------------
# Parameter packing: fold w1/b1/w2/b2/w3/b3 into one zero-padded weight slab
# and one bias slab.  Zero padding keeps the real logits bit-identical.
# ---------------------------------------------------------------------------
def pack_params(params, obs_dim, act_dim, hidden=HIDDEN):
    assert hidden <= H_PAD and act_dim <= LANE
    w1, b1, w2, b2, w3, b3 = params
    obs_p = _round_up(obs_dim, SUBLANE)

    w_slab = jnp.zeros((obs_p + 2 * H_PAD, LANE), jnp.float32)
    w_slab = w_slab.at[:obs_dim, :hidden].set(w1)
    w_slab = w_slab.at[obs_p:obs_p + hidden, :hidden].set(w2)
    w_slab = w_slab.at[obs_p + H_PAD:obs_p + H_PAD + hidden, :act_dim].set(w3)

    b_slab = jnp.zeros((SUBLANE, LANE), jnp.float32)
    b_slab = b_slab.at[0, :hidden].set(b1[0])
    b_slab = b_slab.at[1, :hidden].set(b2[0])
    b_slab = b_slab.at[2, :act_dim].set(b3[0])
    return w_slab, b_slab


# ---------------------------------------------------------------------------
# Wrapper: pads batch/obs, launches a gridded pallas_call, slices the result.
# ---------------------------------------------------------------------------
def policy_forward(x, w_slab, b_slab, act_dim, tile_m=512):
    batch, obs_dim = x.shape
    obs_p = _round_up(obs_dim, SUBLANE)

    # Batch tile: at most tile_m rows, at least a sublane multiple.
    tile_m = min(tile_m, max(SUBLANE, _round_up(batch, SUBLANE)))
    padded_batch = _round_up(batch, tile_m)
    num_tiles = padded_batch // tile_m

    x_p = jnp.zeros((padded_batch, obs_p), jnp.float32)
    x_p = x_p.at[:batch, :obs_dim].set(x.astype(jnp.float32))

    # Advisory cost hint for XLA's scheduler around the custom call.
    flops = 2 * padded_batch * (obs_p * H_PAD + H_PAD * H_PAD + H_PAD * H_PAD)
    bytes_accessed = 4 * (padded_batch * obs_p + padded_batch * LANE
                          + w_slab.size + b_slab.size)
    cost = pl.CostEstimate(flops=flops, transcendentals=0,
                           bytes_accessed=bytes_accessed)

    out_padded = pl.pallas_call(
        policy_mlp_kernel,
        out_shape=jax.ShapeDtypeStruct((padded_batch, LANE), jnp.float32),
        grid=(num_tiles,),
        in_specs=[
            pl.BlockSpec((tile_m, obs_p), lambda i: (i, 0)),       # x: varies with i
            pl.BlockSpec(w_slab.shape, lambda i: (0, 0)),          # weights: VMEM-resident
            pl.BlockSpec(b_slab.shape, lambda i: (0, 0)),          # biases:  VMEM-resident
        ],
        out_specs=pl.BlockSpec((tile_m, LANE), lambda i: (i, 0)),  # lane-dense output
        compiler_params=pltpu.CompilerParams(
            dimension_semantics=("parallel",)),                    # 2x on v7x megacore
        cost_estimate=cost,
    )(x_p, w_slab, b_slab)

    return out_padded[:batch, :act_dim]


# ---------------------------------------------------------------------------
# Init mimicking PyTorch nn.Linear default U(-1/sqrt(fan_in), 1/sqrt(fan_in)).
# Weights stored as (in_features, out_features) so the kernel does x @ W + b.
# ---------------------------------------------------------------------------
def init_params(key, obs_dim, act_dim, hidden=HIDDEN):
    keys = jax.random.split(key, 6)

    def linear(kw, kb, fan_in, fan_out):
        bound = 1.0 / jnp.sqrt(jnp.float32(fan_in))
        w = jax.random.uniform(kw, (fan_in, fan_out), jnp.float32, -bound, bound)
        b = jax.random.uniform(kb, (1, fan_out), jnp.float32, -bound, bound)
        return w, b

    w1, b1 = linear(keys[0], keys[1], obs_dim, hidden)
    w2, b2 = linear(keys[2], keys[3], hidden, hidden)
    w3, b3 = linear(keys[4], keys[5], hidden, act_dim)
    return (w1, b1, w2, b2, w3, b3)


def _reference(x, params):
    w1, b1, w2, b2, w3, b3 = params
    h = jnp.maximum(x @ w1 + b1, 0.0)
    h = jnp.maximum(h @ w2 + b2, 0.0)
    return h @ w3 + b3


if __name__ == "__main__":
    key = jax.random.PRNGKey(0)
    k_params, k_x1, k_x2, k_x3 = jax.random.split(key, 4)

    obs_dim = 4   # CartPole-v1 observation dim
    act_dim = 2   # CartPole-v1 action dim

    params = init_params(k_params, obs_dim, act_dim)
    w_slab, b_slab = pack_params(params, obs_dim, act_dim)

    # Small demo batch (single grid tile).
    batch = 8
    x_small = jax.random.normal(k_x1, (batch, obs_dim), jnp.float32)
    out_small = policy_forward(x_small, w_slab, b_slab, act_dim)
    jax.block_until_ready(out_small)
    assert out_small.shape == (batch, act_dim)
    assert jnp.allclose(out_small, _reference(x_small, params), atol=2e-5), \
        "small-batch mismatch vs reference"

    # Batch that is not a multiple of the tile (exercises the padding path).
    odd_batch = 300
    x_odd = jax.random.normal(k_x3, (odd_batch, obs_dim), jnp.float32)
    out_odd = policy_forward(x_odd, w_slab, b_slab, act_dim)
    jax.block_until_ready(out_odd)
    assert out_odd.shape == (odd_batch, act_dim)
    assert jnp.allclose(out_odd, _reference(x_odd, params), atol=2e-5), \
        "odd-batch mismatch vs reference"

    # Larger stacked batch exercising the multi-tile grid path (2 tiles of 512).
    big_batch = 1024
    x_big = jax.random.normal(k_x2, (big_batch, obs_dim), jnp.float32)
    out_big = policy_forward(x_big, w_slab, b_slab, act_dim)
    jax.block_until_ready(out_big)
    assert out_big.shape == (big_batch, act_dim)
    assert jnp.allclose(out_big, _reference(x_big, params), atol=2e-5), \
        "big-batch mismatch vs reference"

    print("KERNEL_OK")
</pallas_src>

<mosaic_0001>
module attributes {stable_mosaic.version = 11 : i64} {
  func.func @policy_mlp_kernel(%arg0: i32, %arg1: memref<8x8xf32, #tpu.memory_space<vmem>>, %arg2: memref<264x128xf32, #tpu.memory_space<vmem>>, %arg3: memref<8x128xf32, #tpu.memory_space<vmem>>, %arg4: memref<8x128xf32, #tpu.memory_space<vmem>>) attributes {dimension_semantics = [#tpu.dimension_semantics<parallel>], iteration_bounds = array<i64: 1>, scalar_prefetch = 0 : i64, scratch_operands = 0 : i64, tpu.core_type = #tpu.core_type<tc>, window_params = [{transform_indices = @transform_0, window_bounds = array<i64: 8, 8>}, {pipeline_mode = #tpu.pipeline_mode<synchronous>, transform_indices = @transform_1, window_bounds = array<i64: 264, 128>}, {pipeline_mode = #tpu.pipeline_mode<synchronous>, transform_indices = @transform_2, window_bounds = array<i64: 8, 128>}, {transform_indices = @transform_3, window_bounds = array<i64: 8, 128>}]} {
    %c0 = arith.constant 0 : index
    %c0_0 = arith.constant 0 : index
    %0 = vector.load %arg1[%c0, %c0_0] : memref<8x8xf32, #tpu.memory_space<vmem>>, vector<8x8xf32>
    %c0_1 = arith.constant 0 : index
    %c0_2 = arith.constant 0 : index
    %1 = vector.load %arg2[%c0_1, %c0_2] : memref<264x128xf32, #tpu.memory_space<vmem>>, vector<8x128xf32>
    %c8 = arith.constant 8 : index
    %c0_3 = arith.constant 0 : index
    %2 = vector.load %arg2[%c8, %c0_3] : memref<264x128xf32, #tpu.memory_space<vmem>>, vector<128x128xf32>
    %c136 = arith.constant 136 : index
    %c0_4 = arith.constant 0 : index
    %3 = vector.load %arg2[%c136, %c0_4] : memref<264x128xf32, #tpu.memory_space<vmem>>, vector<128x128xf32>
    %c0_5 = arith.constant 0 : index
    %c0_6 = arith.constant 0 : index
    %4 = vector.load %arg3[%c0_5, %c0_6] : memref<8x128xf32, #tpu.memory_space<vmem>>, vector<1x128xf32>
    %c1 = arith.constant 1 : index
    %c0_7 = arith.constant 0 : index
    %5 = vector.load %arg3[%c1, %c0_7] : memref<8x128xf32, #tpu.memory_space<vmem>>, vector<1x128xf32>
    %c2 = arith.constant 2 : index
    %c0_8 = arith.constant 0 : index
    %6 = vector.load %arg3[%c2, %c0_8] : memref<8x128xf32, #tpu.memory_space<vmem>>, vector<1x128xf32>
    %cst = arith.constant dense<0.000000e+00> : vector<8x128xf32>
    %7 = tpu.matmul %0, %1, %cst {dimension_numbers = #tpu.dot_dimension_numbers<[1], [0], [0], [1], [0, 0, 1, 1], [], []>} : vector<8x8xf32>, vector<8x128xf32>, vector<8x128xf32> -> vector<8x128xf32>
    %8 = vector.broadcast %4 : vector<1x128xf32> to vector<8x128xf32>
    %9 = arith.addf %7, %8 : vector<8x128xf32>
    %cst_9 = arith.constant 0.000000e+00 : f32
    %10 = vector.broadcast %cst_9 : f32 to vector<8x128xf32>
    %11 = arith.maximumf %9, %10 : vector<8x128xf32>
    %cst_10 = arith.constant dense<0.000000e+00> : vector<8x128xf32>
    %12 = tpu.matmul %11, %2, %cst_10 {dimension_numbers = #tpu.dot_dimension_numbers<[1], [0], [0], [1], [0, 0, 1, 1], [], []>} : vector<8x128xf32>, vector<128x128xf32>, vector<8x128xf32> -> vector<8x128xf32>
    %13 = vector.broadcast %5 : vector<1x128xf32> to vector<8x128xf32>
    %14 = arith.addf %12, %13 : vector<8x128xf32>
    %cst_11 = arith.constant 0.000000e+00 : f32
    %15 = vector.broadcast %cst_11 : f32 to vector<8x128xf32>
    %16 = arith.maximumf %14, %15 : vector<8x128xf32>
    %cst_12 = arith.constant dense<0.000000e+00> : vector<8x128xf32>
    %17 = tpu.matmul %16, %3, %cst_12 {dimension_numbers = #tpu.dot_dimension_numbers<[1], [0], [0], [1], [0, 0, 1, 1], [], []>} : vector<8x128xf32>, vector<128x128xf32>, vector<8x128xf32> -> vector<8x128xf32>
    %18 = vector.broadcast %6 : vector<1x128xf32> to vector<8x128xf32>
    %19 = arith.addf %17, %18 : vector<8x128xf32>
    %c0_13 = arith.constant 0 : index
    %c0_14 = arith.constant 0 : index
    %20 = vector.load %arg4[%c0_13, %c0_14] : memref<8x128xf32, #tpu.memory_space<vmem>>, vector<8x128xf32>
    tpu.vector_store %arg4[%c0_13, %c0_14], %19 {strides = array<i32>} : memref<8x128xf32, #tpu.memory_space<vmem>>, vector<8x128xf32>,
    return
  }
  func.func @transform_0(%arg0: i32) -> (i32, i32) {
    %c0_i32 = arith.constant 0 : i32
    %c0_i32_0 = arith.constant 0 : i32
    return %arg0, %c0_i32 : i32, i32
  }
  func.func @transform_1(%arg0: i32) -> (i32, i32) {
    %c0_i32 = arith.constant 0 : i32
    %c0_i32_0 = arith.constant 0 : i32
    %c0_i32_1 = arith.constant 0 : i32
    return %c0_i32, %c0_i32_0 : i32, i32
  }
  func.func @transform_2(%arg0: i32) -> (i32, i32) {
    %c0_i32 = arith.constant 0 : i32
    %c0_i32_0 = arith.constant 0 : i32
    %c0_i32_1 = arith.constant 0 : i32
    return %c0_i32, %c0_i32_0 : i32, i32
  }
  func.func @transform_3(%arg0: i32) -> (i32, i32) {
    %c0_i32 = arith.constant 0 : i32
    %c0_i32_0 = arith.constant 0 : i32
    return %arg0, %c0_i32 : i32, i32
  }
}

</mosaic_0001>

<bundles_post_ra>
// kernel: tpu_custom_call.1
= control target key start
LH: loop header
LB: loop body
LE: loop exit
PB: predicated region body
PF: predicated region fallthrough
CT: control target
= control target key end

     0   :  { %8 = vsyncpa [#allocation3], 0  ;;  %s696_s0 = inlined_call_operand.hbm [shape: f32[8,8], index: 0, kind: input, shape index: {}]   ;;  %s697_s1 = inlined_call_operand.hbm [shape: f32[264,128], index: 1, kind: input, shape index: {}]   ;;  %s698_s2 = inlined_call_operand.hbm [shape: f32[8,128], index: 2, kind: input, shape index: {}]   ;;  %s699_s3 = inlined_call_operand.hbm [shape: f32[8,128], index: 3, kind: output, shape index: {}]  }
   0x1   :  { %9 = vsyncpa [#allocation6], 0 }
   0x2   :  { %10 = vsyncpa [#allocation4], 0  ;;  %s600_s12 = smov [#allocation5]   ;;  %s506_s16 = scalar_lea.hbm %s697_s1, 4224 }
   0x3   :  { %s26_s13 = sshll.u32 %s600_s12, 4  ;;  %p507_p0 = scmp.ne.s32.totalorder %s697_s1, %s506_s16  ;;  %s27_s13 = int_to_ptr.vmem [resolvable:$true] %s26_s13 }
   0x4   :  { %p510_p1 = scmp.lt.u32.totalorder %s506_s16, %s697_s1 }
   0x6   :  { %p512_p2 = pnand %p510_p1, %p507_p0 }
   0x8   :  { %515 = shalt.err (!%p512_p2)
}
   0x9   :  { %s516_s21 = scalar_lea.vmem %s27_s13, 4224  ;;  %p521_p4 = scmp.lt.s32.totalorder %s27_s13, %s27_s13 }
   0xa   :  { %p517_p3 = scmp.ne.s32.totalorder %s27_s13, %s516_s21  ;;  %p522_p5 = scmp.lt.s32.totalorder %s516_s21, %s516_s21 }
   0xc   :  { %p523_p6 = por %p522_p5, %p521_p4 }
   0xe   :  { %p524_p7 = pnand %p523_p6, %p517_p3 }
  0x10   :  { %527 = shalt.err (!%p524_p7)
}
  0x11   :  { %s601_s22 = smov 128   ;;  %s602_s23 = smov 8  }
  0x12   :  { %32 = dma.hbm_to_vmem [thread:$0]  %s697_s1, 4224, %s27_s13, [#allocation6], %s601_s22, %s601_s22, %s602_s23  }
  0x13   :  { %s603_s26 = smov [#allocation2]   ;;  %s604_s28 = smov [#allocation7]  }
  0x14   :  { %s17_s27 = sshll.u32 %s603_s26, 4  ;;  %s39_s29 = sshll.u32 %s604_s28, 4  ;;  %s18_s27 = int_to_ptr.vmem [resolvable:$true] %s17_s27  ;;  %s40_s29 = int_to_ptr.vmem [resolvable:$true] %s39_s29 }
  0x15   :  { %s528_s5 = scalar_lea.hbm %s696_s0, 128 }
  0x16   :  { %p529_p8 = scmp.ne.s32.totalorder %s696_s0, %s528_s5  ;;  %p532_p9 = scmp.lt.u32.totalorder %s528_s5, %s696_s0 }
  0x18   :  { %p534_p10 = pnand %p532_p9, %p529_p8 }
  0x1a   :  { %537 = shalt.err (!%p534_p10)
}
  0x1b   :  { %s538_s1 = scalar_lea.vmem %s18_s27, 128  ;;  %p543_p12 = scmp.lt.s32.totalorder %s18_s27, %s18_s27 }
  0x1c   :  { %p539_p11 = scmp.ne.s32.totalorder %s18_s27, %s538_s1  ;;  %p544_p13 = scmp.lt.s32.totalorder %s538_s1, %s538_s1 }
  0x1e   :  { %p545_p0 = por %p544_p13, %p543_p12 }
  0x20   :  { %p546_p1 = pnand %p545_p0, %p539_p11 }
  0x22   :  { %549 = shalt.err (!%p546_p1)
}
  0x23   :  { %20 = dma.hbm_to_vmem [thread:$0]  %s696_s0, 128, %s18_s27, [#allocation3]  }
  0x24   :  { %s550_s14 = scalar_lea.hbm %s698_s2, 128 }
  0x25   :  { %p551_p2 = scmp.ne.s32.totalorder %s698_s2, %s550_s14  ;;  %p554_p3 = scmp.lt.u32.totalorder %s550_s14, %s698_s2 }
  0x27   :  { %p556_p4 = pnand %p554_p3, %p551_p2 }
  0x29   :  { %559 = shalt.err (!%p556_p4)
}
  0x2a   :  { %s560_s19 = scalar_lea.vmem %s40_s29, 128  ;;  %p565_p6 = scmp.lt.s32.totalorder %s40_s29, %s40_s29 }
  0x2b   :  { %p561_p5 = scmp.ne.s32.totalorder %s40_s29, %s560_s19  ;;  %p566_p7 = scmp.lt.s32.totalorder %s560_s19, %s560_s19 }
  0x2d   :  { %p567_p8 = por %p566_p7, %p565_p6 }
  0x2f   :  { %p568_p9 = pnand %p567_p8, %p561_p5 }
  0x31   :  { %571 = shalt.err (!%p568_p9)
}
  0x32   :  { %42 = dma.hbm_to_vmem [thread:$0]  %s698_s2, 128, %s40_s29, [#allocation6]  }
  0x33   :  { %594 = dma.done.wait [#allocation3], 128  }
  0x34   :  { %595 = vsyncadd [#allocation3], 4294967168 }
  0x35   :  { %596 = dma.done.wait [#allocation6], 4352  }
  0x36   :  { %597 = vsyncadd [#allocation6], 4294962944  ;;  %v605_v0 = vmov 0.0   ;;  %vm606_vm0 = vmmov 0   ;;  %v607_v1 = vmov 0.0|0.0   ;;  %vm93_vm1 = vcmask 64512  }
  0x37   :  { %374 = vmatprep.subr.mxu0 %v605_v0  ;;  %376 = vmatprep.mubr.msk.f32.mxu0 %vm606_vm0, %v605_v0  ;;  %v53_v2 = vld [vmem:[#allocation5] sm:$0xff]  ;;  %v52_v3 = vld [vmem:[#allocation2] sm:$0xff]  ;;  %v54_v4 = vld [vmem:[#allocation5 + $0x8] sm:$0xff]  ;;  %s608_s2 = smov [#allocation8]  }
  0x38   :  { %449 = vmatprep.subr.bf16.mxu1 %v607_v1  ;;  %411 = vmatprep.mubr.msk.f32.mxu1 %vm606_vm0, %v605_v0  ;;  %v55_v5 = vld [vmem:[#allocation5 + $0x10] sm:$0xff]  ;;  %v56_v6 = vld [vmem:[#allocation5 + $0x18] sm:$0xff]  ;;  %v57_v7 = vld [vmem:[#allocation5 + $0x20] sm:$0xff]  ;;  %s324_s21 = sshll.u32 %s608_s2, 4  ;;  %s325_s21 = int_to_ptr.vmem [resolvable:$true] %s324_s21 }
  0x39   :  { %375 = vmatpush3.msra.mxu0 %v53_v2  ;;  %v450_v8 = vpack.c.bf16 %v55_v5, %v54_v4  ;;  %v453_v9 = vpack.c.bf16 %v57_v7, %v56_v6  ;;  %v58_v10 = vld [vmem:[#allocation5 + $0x28] sm:$0xff]  ;;  %v59_v11 = vld [vmem:[#allocation5 + $0x30] sm:$0xff]  ;;  %v60_v13 = vld [vmem:[#allocation5 + $0x38] sm:$0xff]  ;;  %s572_s22 = scalar_lea.vmem %s325_s21, 128  ;;  %p577_p11 = scmp.lt.s32.totalorder %s325_s21, %s325_s21 }
  0x3a   :  { %377 = vmatmul.mubr.msk.f32.vlgmr.msra.gmra.mrb[0].mxu0 %vm93_vm1, %v52_v3  ;;  %473 = vmatprep.subr.bf16.mxu0 %v607_v1  ;;  %v456_v12 = vpack.c.bf16 %v59_v11, %v58_v10  ;;  %v61_v14 = vld [vmem:[#allocation5 + $0x40] sm:$0xff]  ;;  %v62_v16 = vld [vmem:[#allocation5 + $0x48] sm:$0xff]  ;;  %v63_v17 = vld [vmem:[#allocation5 + $0x50] sm:$0xff]  ;;  %p573_p10 = scmp.ne.s32.totalorder %s325_s21, %s572_s22  ;;  %p578_p12 = scmp.lt.s32.totalorder %s572_s22, %s572_s22 }
  0x3b   :  { %446 = vmatprep.mubr.msk.f32.mxu0 %vm606_vm0, %v605_v0  ;;  %451 = vmatpush3.bf16.msra.mxu1 %v450_v8  ;;  %v459_v15 = vpack.c.bf16 %v61_v14, %v60_v13  ;;  %v462_v18 = vpack.c.bf16 %v63_v17, %v62_v16  ;;  %v64_v19 = vld [vmem:[#allocation5 + $0x58] sm:$0xff]  ;;  %v65_v20 = vld [vmem:[#allocation5 + $0x60] sm:$0xff]  ;;  %v66_v22 = vld [vmem:[#allocation5 + $0x68] sm:$0xff] }
  0x3c   :  { %452 = vmatprep.subr.bf16.mxu1 %v607_v1  ;;  %v465_v21 = vpack.c.bf16 %v65_v20, %v64_v19  ;;  %v67_v23 = vld [vmem:[#allocation5 + $0x70] sm:$0xff]  ;;  %v68_v25 = vld [vmem:[#allocation5 + $0x78] sm:$0xff]  ;;  %v69_v26 = vld [vmem:[#allocation5 + $0x80] sm:$0xff]  ;;  %p579_p13 = por %p578_p12, %p577_p11 }
  0x3d   :  { %v468_v24 = vpack.c.bf16 %v67_v23, %v66_v22  ;;  %v471_v27 = vpack.c.bf16 %v69_v26, %v68_v25  ;;  %v70_v28 = vld [vmem:[#allocation5 + $0x88] sm:$0xff]  ;;  %v71_v29 = vld [vmem:[#allocation5 + $0x90] sm:$0xff]  ;;  %v72_v30 = vld [vmem:[#allocation5 + $0x98] sm:$0xff] }
  0x3e   :  { %v474_v31 = vpack.c.bf16 %v71_v29, %v70_v28  ;;  %v73_v32 = vld [vmem:[#allocation5 + $0xa0] sm:$0xff]  ;;  %v74_v34 = vld [vmem:[#allocation5 + $0xa8] sm:$0xff]  ;;  %v75_v35 = vld [vmem:[#allocation5 + $0xb0] sm:$0xff]  ;;  %p580_p0 = pnand %p579_p13, %p573_p10 }
  0x3f   :  { %454 = vmatpush3.bf16.msra.mxu1 %v453_v9  ;;  %v477_v33 = vpack.c.bf16 %v73_v32, %v72_v30  ;;  %v480_v36 = vpack.c.bf16 %v75_v35, %v74_v34  ;;  %v76_v37 = vld [vmem:[#allocation5 + $0xb8] sm:$0xff]  ;;  %v77_v38 = vld [vmem:[#allocation5 + $0xc0] sm:$0xff]  ;;  %v78_v40 = vld [vmem:[#allocation5 + $0xc8] sm:$0xff] }
  0x40   :  { %455 = vmatprep.subr.bf16.mxu1 %v607_v1  ;;  %475 = vmatpush3.bf16.msra.mxu0 %v474_v31  ;;  %v483_v39 = vpack.c.bf16 %v77_v38, %v76_v37  ;;  %v79_v41 = vld [vmem:[#allocation5 + $0xd0] sm:$0xff]  ;;  %v80_v43 = vld [vmem:[#allocation5 + $0xd8] sm:$0xff]  ;;  %v81_v44 = vld [vmem:[#allocation5 + $0xe0] sm:$0xff] }
  0x41   :  { %476 = vmatprep.subr.bf16.mxu0 %v607_v1  ;;  %v486_v42 = vpack.c.bf16 %v79_v41, %v78_v40  ;;  %v489_v45 = vpack.c.bf16 %v81_v44, %v80_v43  ;;  %v82_v46 = vld [vmem:[#allocation5 + $0xe8] sm:$0xff]  ;;  %v83_v47 = vld [vmem:[#allocation5 + $0xf0] sm:$0xff]  ;;  %v84_v54 = vld [vmem:[#allocation5 + $0xf8] sm:$0xff] }
  0x42   :  { %v492_v48 = vpack.c.bf16 %v83_v47, %v82_v46  ;;  %v334_v49 = vld [vmem:[#allocation7] ss:$0 sm:$0xff]  ;;  %v85_v55 = vld [vmem:[#allocation5 + $0x100] sm:$0xff]  ;;  %v336_v57 = vld [vmem:[#allocation7 + $0x1] ss:$0 sm:$0xff] }
  0x43   :  { %457 = vmatpush3.bf16.msra.mxu1 %v456_v12  ;;  %v495_v56 = vpack.c.bf16 %v85_v55, %v84_v54  ;;  %v337_v62 = vld [vmem:[#allocation7 + $0x2] ss:$0 sm:$0xff] }
  0x44   :  { %458 = vmatprep.subr.bf16.mxu1 %v607_v1  ;;  %478 = vmatpush3.bf16.msra.mxu0 %v477_v33 }
  0x45   :  { %479 = vmatprep.subr.bf16.mxu0 %v607_v1 }
  0x47   :  { %460 = vmatpush3.bf16.msra.mxu1 %v459_v15 }
  0x48   :  { %461 = vmatprep.subr.bf16.mxu1 %v607_v1  ;;  %481 = vmatpush3.bf16.msra.mxu0 %v480_v36 }
  0x49   :  { %482 = vmatprep.subr.bf16.mxu0 %v607_v1 }
  0x4b   :  { %463 = vmatpush3.bf16.msra.mxu1 %v462_v18 }
  0x4c   :  { %464 = vmatprep.subr.bf16.mxu1 %v607_v1  ;;  %484 = vmatpush3.bf16.msra.mxu0 %v483_v39 }
  0x4d   :  { %485 = vmatprep.subr.bf16.mxu0 %v607_v1 }
  0x4f   :  { %466 = vmatpush3.bf16.msra.mxu1 %v465_v21 }
  0x50   :  { %467 = vmatprep.subr.bf16.mxu1 %v607_v1  ;;  %487 = vmatpush3.bf16.msra.mxu0 %v486_v42 }
  0x51   :  { %488 = vmatprep.subr.bf16.mxu0 %v607_v1 }
  0x53   :  { %469 = vmatpush3.bf16.msra.mxu1 %v468_v24 }
  0x54   :  { %470 = vmatprep.subr.bf16.mxu1 %v607_v1  ;;  %490 = vmatpush3.bf16.msra.mxu0 %v489_v45 }
  0x55   :  { %491 = vmatprep.subr.bf16.mxu0 %v607_v1 }
  0x57   :  { %472 = vmatpush3.bf16.msra.mxu1 %v471_v27 }
  0x58   :  { %493 = vmatpush3.bf16.msra.mxu0 %v492_v48 }
  0x59   :  { %494 = vmatprep.subr.bf16.mxu0 %v607_v1 }
  0x5c   :  { %496 = vmatpush3.bf16.msra.mxu0 %v495_v56 }
 0x10d   :  { %v163_v50 = vpop.f32.mrb[0].mxu0 }
 0x10e   :  { %v164_v51 = vadd.f32 %v334_v49, %v163_v50  ;;  %v378_v52 = vpop.f32.mrb[1].mxu0 }
 0x110   :  { %v167_v53 = vmax.f32 %v164_v51, 0.0 }
 0x112   :  { %412 = vmatmul.mubr.f32.vlgmr.msra.gmra.mrb[0].mxu1 %v167_v53 }
 0x1e5   :  { %v238_v58 = vpop.f32.mrb[0].mxu1 }
 0x1e6   :  { %v239_v59 = vadd.f32 %v336_v57, %v238_v58  ;;  %v413_v60 = vpop.f32.mrb[1].mxu1 }
 0x1e8   :  { %v242_v61 = vmax.f32 %v239_v59, 0.0 }
 0x1ea   :  { %447 = vmatmul.mubr.f32.vlgmr.msra.gmra.mrb[2].mxu0 %v242_v61 }
 0x2bd   :  { %v313_v63 = vpop.f32.mrb[2].mxu0 }
 0x2be   :  { %v314_v0 = vadd.f32 %v337_v62, %v313_v63  ;;  %v448_v1 = vpop.f32.mrb[3].mxu0 }
 0x2c0   :  { %317 = vst [vmem:[#allocation8] sm:$0xff] %v314_v0 }
 0x2c1   :  { %583 = shalt.err (!%p580_p0)
}
 0x2c2   :  { %s584_s25 = scalar_lea.hbm %s699_s3, 128 }
 0x2c3   :  { %p585_p1 = scmp.ne.s32.totalorder %s699_s3, %s584_s25  ;;  %p588_p2 = scmp.lt.u32.totalorder %s584_s25, %s699_s3 }
 0x2c5   :  { %p590_p3 = pnand %p588_p2, %p585_p1 }
 0x2c7   :  { %593 = shalt.err (!%p590_p3)
}
 0x2c8   :  { %327 = dma.vmem_to_hbm [thread:$0]  %s325_s21, 128, %s699_s3, [#allocation4]  }
 0x2c9   :  { %598 = dma.done.wait [#allocation4], 128  }
 0x2ca   :  { %599 = vsyncadd [#allocation4], 4294967168 }
 0x2cb   :  { %331 = vsyncpa [#allocation3], 1 }
 0x2cc   :  { %332 = vsyncpa [#allocation6], 1 }
 0x2cd   :  { %333 = vsyncpa [#allocation4], 1 }

</bundles_post_ra>
